<compile_context>
chip_gen: v7x
topology: tpu7x:2x2x1
jax: 0.10.0
libtpu: 0.0.40
codegen_flags: <defaults>
</compile_context>

<pallas_src>
import functools
import math

import jax
import jax.numpy as jnp
from jax.experimental import pallas as pl
from jax.experimental.pallas import tpu as pltpu


def _round_up(v, m):
    return ((v + m - 1) // m) * m


def _sigmoid_via_tanh(z):
    # sigmoid(z) == 0.5 * (1 + tanh(z/2)): one EUP op instead of exp + reciprocal.
    return 0.5 * (1.0 + jnp.tanh(0.5 * z))


# ---------------------------------------------------------------------------
# Kernel: one ResLSTM cell step per (batch_tile, t) grid point.
#   grid = (num_batch_tiles, T); t is innermost & "arbitrary"; h/c carried in
#   f32 VMEM scratch; weights resident across the whole grid.
# ---------------------------------------------------------------------------
def _res_lstm_seq_kernel(x_ref, h0_ref, c0_ref, wx_ref, wh_ref, b_ref,
                         wp_ref, bp_ref, hseq_ref, clast_ref,
                         h_scr, c_scr, *, hp, use_res_cols):
    t = pl.program_id(1)

    @pl.when(t == 0)
    def _():
        h_scr[...] = h0_ref[...].astype(jnp.float32)
        c_scr[...] = c0_ref[...].astype(jnp.float32)

    x = x_ref[...]                                    # (TB, I)  matmul dtype
    h_prev = h_scr[...]                               # (TB, Hp) f32
    c_prev = c_scr[...]                               # (TB, Hp) f32

    # x-side fused matmul: [gates | residual] columns in one MXU pass.
    acts = (jnp.dot(x, wx_ref[...], preferred_element_type=jnp.float32)
            + b_ref[...])                             # (TB, Gx) f32
    # h-side gate matmul, accumulated into the same f32 result.
    gates = acts[:, :4 * hp] + jnp.dot(h_prev.astype(wh_ref.dtype), wh_ref[...],
                                       preferred_element_type=jnp.float32)

    ingate = _sigmoid_via_tanh(gates[:, 0 * hp:1 * hp])
    forgetgate = _sigmoid_via_tanh(gates[:, 1 * hp:2 * hp])
    cellgate = jnp.tanh(gates[:, 2 * hp:3 * hp])
    outgate = _sigmoid_via_tanh(gates[:, 3 * hp:4 * hp])

    c_t = c_prev * forgetgate + ingate * cellgate
    r_t = jnp.tanh(c_t)

    # m_t = W_p(r_t): the only matmul that cannot be fused (depends on r_t).
    m_t = (jnp.dot(r_t.astype(wp_ref.dtype), wp_ref[...],
                   preferred_element_type=jnp.float32)
           + bp_ref[...])

    if use_res_cols:
        residual = acts[:, 4 * hp:]                   # W_h(x)+b_h (or padded x)
    else:
        residual = x.astype(jnp.float32)              # I == H == Hp: x itself

    h_t = outgate * (m_t + residual)

    h_scr[...] = h_t
    c_scr[...] = c_t
    hseq_ref[...] = h_t.astype(hseq_ref.dtype)        # streamed every step
    clast_ref[...] = c_t.astype(clast_ref.dtype)      # resident; final survives


# ---------------------------------------------------------------------------
# Parameter init / one-time fusion & padding (do OUTSIDE any timestep loop).
# ---------------------------------------------------------------------------
def init_res_lstm_params(key, input_size, hidden_size, dtype=jnp.float32):
    """Uniform(+-1/sqrt(H)) init matching ResLSTMCell.reset_parameters."""
    std = 1.0 / math.sqrt(hidden_size)
    ks = jax.random.split(key, 8)
    u = lambda k, shape: jax.random.uniform(k, shape, dtype, minval=-std, maxval=std)
    return dict(
        w_x2h=u(ks[0], (4 * hidden_size, input_size)),
        b_x2h=u(ks[1], (4 * hidden_size,)),
        w_h2h=u(ks[2], (4 * hidden_size, hidden_size)),
        b_h2h=u(ks[3], (4 * hidden_size,)),
        w_p=u(ks[4], (hidden_size, hidden_size)),
        b_p=u(ks[5], (hidden_size,)),
        w_h=u(ks[6], (hidden_size, input_size)),
        b_h=u(ks[7], (hidden_size,)),
    )


def prepare_res_lstm_params(params, input_size, hidden_size,
                            compute_dtype=jnp.bfloat16):
    """One-time weight fusion, transposition and 128-lane padding.

    Builds:
      w_x : (I,  Gx)  = [Wx^T per-gate padded | residual block]   (Gx = 4Hp or 5Hp)
      w_h : (Hp, 4Hp) = Wh^T zero-padded rows/cols
      b   : (1,  Gx)  f32 = [bx+bh per-gate padded | b_res padded]
      w_p : (Hp, Hp), b_p : (1, Hp) f32
    where Hp = round_up(H, 128).  Padded gate columns give sigmoid(0)/tanh(0),
    so padded h/c state columns stay exactly zero through the recurrence.
    """
    I, H = input_size, hidden_size
    Hp = _round_up(H, 128)
    f32 = jnp.float32
    same_size = (I == H)
    use_res_cols = (not same_size) or (Hp != H)

    def pad_cols_per_gate(w):                      # (K, 4H) -> (K, 4Hp)
        if Hp == H:
            return w
        blocks = [jnp.pad(w[:, g * H:(g + 1) * H], ((0, 0), (0, Hp - H)))
                  for g in range(4)]
        return jnp.concatenate(blocks, axis=1)

    def pad_vec_per_gate(b):                       # (4H,) -> (4Hp,)
        if Hp == H:
            return b
        blocks = [jnp.pad(b[g * H:(g + 1) * H], (0, Hp - H)) for g in range(4)]
        return jnp.concatenate(blocks)

    wx = pad_cols_per_gate(jnp.transpose(params["w_x2h"]).astype(f32))   # (I, 4Hp)
    wh = pad_cols_per_gate(jnp.transpose(params["w_h2h"]).astype(f32))   # (H, 4Hp)
    wh = jnp.pad(wh, ((0, Hp - H), (0, 0)))                               # (Hp, 4Hp)
    b_gates = pad_vec_per_gate(params["b_x2h"].astype(f32)
                               + params["b_h2h"].astype(f32))             # (4Hp,)

    if use_res_cols:
        if same_size:   # identity residual, folded so the output stays Hp-wide
            w_res = jnp.pad(jnp.eye(I, H, dtype=f32), ((0, 0), (0, Hp - H)))
            b_res = jnp.zeros((Hp,), f32)
        else:           # W_h(x) + b_h residual projection
            w_res = jnp.pad(jnp.transpose(params["w_h"]).astype(f32),
                            ((0, 0), (0, Hp - H)))                        # (I, Hp)
            b_res = jnp.pad(params["b_h"].astype(f32), (0, Hp - H))       # (Hp,)
        w_x_full = jnp.concatenate([wx, w_res], axis=1)                    # (I, 5Hp)
        b_all = jnp.concatenate([b_gates, b_res])[None, :]                 # (1, 5Hp)
    else:
        w_x_full = wx                                                      # (I, 4Hp)
        b_all = b_gates[None, :]                                           # (1, 4Hp)

    w_p = jnp.pad(jnp.transpose(params["w_p"]).astype(f32),
                  ((0, Hp - H), (0, Hp - H)))                              # (Hp, Hp)
    b_p = jnp.pad(params["b_p"].astype(f32), (0, Hp - H))[None, :]         # (1, Hp)

    mm_dtype = jnp.dtype(jnp.float32 if compute_dtype is None else compute_dtype)
    return dict(
        w_x=w_x_full.astype(mm_dtype), w_h=wh.astype(mm_dtype), b=b_all,
        w_p=w_p.astype(mm_dtype), b_p=b_p,
        input_size=I, hidden_size=H, hidden_padded=Hp,
        use_res_cols=use_res_cols, mm_dtype=mm_dtype)


# ---------------------------------------------------------------------------
# Wrappers
# ---------------------------------------------------------------------------
def _default_tb_cap():
    # 256 fills the 2x256^2 MXUs on v6e/v7x; keep 128 on v5e (4x128^2 MXU).
    try:
        kind = jax.devices()[0].device_kind.lower()
        if "v5 lite" in kind or "v5e" in kind or "v5litepod" in kind:
            return 128
    except Exception:
        pass
    return 256


def _vmem_limit_bytes():
    # Generation-aware: ~85% of physical VMEM (64 MiB fallback, valid everywhere).
    try:
        cap = pltpu.get_tpu_info().vmem_capacity_bytes
    except Exception:
        cap = 64 * 1024 * 1024
    return int(0.85 * cap)


def res_lstm_sequence(x_seq, hidden, prepared, tb_cap=None):
    """Run the ResLSTM cell over a whole sequence inside ONE Pallas kernel.

    x_seq: (T, B, I).  hidden: (hx, cx) of shape (B, H) each, or None.
    Returns (h_seq (T, B, H), (h_T, c_T)).  Weights stay VMEM-resident for the
    entire sequence; h/c are carried in f32 VMEM scratch across timesteps.
    """
    I = prepared["input_size"]
    H = prepared["hidden_size"]
    Hp = prepared["hidden_padded"]
    mm_dtype = prepared["mm_dtype"]
    w_x, w_h, b_all = prepared["w_x"], prepared["w_h"], prepared["b"]
    w_p, b_p = prepared["w_p"], prepared["b_p"]
    Gx = w_x.shape[1]

    T, B, I_in = x_seq.shape
    assert I_in == I, f"input feature dim {I_in} != prepared input_size {I}"
    out_dtype = x_seq.dtype

    if hidden is None:
        h0 = jnp.zeros((B, Hp), out_dtype)
        c0 = jnp.zeros((B, Hp), out_dtype)
    else:
        hx, cx = hidden
        if Hp != H:
            hx = jnp.pad(hx, ((0, 0), (0, Hp - H)))
            cx = jnp.pad(cx, ((0, 0), (0, Hp - H)))
        h0, c0 = hx, cx

    x_mm = x_seq.astype(mm_dtype)     # no-op for f32; halves x bytes for bf16

    if tb_cap is None:
        tb_cap = _default_tb_cap()
    if B <= tb_cap:
        TB, grid_b = B, 1             # full-array batch block (always legal)
    else:
        TB = tb_cap                   # multiple of 32: legal sublane tile for
        grid_b = pl.cdiv(B, TB)       # f32/bf16/int8; edge tile masked by Pallas

    kernel = functools.partial(_res_lstm_seq_kernel, hp=Hp,
                               use_res_cols=prepared["use_res_cols"])

    const = lambda b, t: (0, 0)       # weights/biases: resident across grid
    per_bt = lambda b, t: (t, b, 0)   # x / h_seq: new block every step
    per_b = lambda b, t: (b, 0)       # initial state / final c: per batch tile

    weight_bytes = (w_x.nbytes + w_h.nbytes + b_all.nbytes
                    + w_p.nbytes + b_p.nbytes)
    out_isz = jnp.dtype(out_dtype).itemsize
    cost = pl.CostEstimate(
        flops=int(T * (2 * B * I * Gx + 2 * B * Hp * 4 * Hp
                       + 2 * B * Hp * Hp + 10 * B * Hp)),
        transcendentals=int(T * 5 * B * Hp),
        bytes_accessed=int(x_mm.nbytes + weight_bytes + h0.nbytes + c0.nbytes
                           + (T + 1) * B * Hp * out_isz),
    )

    # NOTE: pl.Buffered(1) on the constant weight specs / CORE_PARALLEL batch
    # sharding on v7x were suggested but are omitted for guaranteed lowering.
    h_seq_p, c_last_p = pl.pallas_call(
        kernel,
        out_shape=(jax.ShapeDtypeStruct((T, B, Hp), out_dtype),
                   jax.ShapeDtypeStruct((B, Hp), out_dtype)),
        grid=(grid_b, T),
        in_specs=[
            pl.BlockSpec((None, TB, I), per_bt),   # x_t
            pl.BlockSpec((TB, Hp), per_b),         # initial h
            pl.BlockSpec((TB, Hp), per_b),         # initial c
            pl.BlockSpec((I, Gx), const),          # fused x-side weight
            pl.BlockSpec((Hp, 4 * Hp), const),     # h-side gate weight
            pl.BlockSpec((1, Gx), const),          # fused bias (f32)
            pl.BlockSpec((Hp, Hp), const),         # W_p^T
            pl.BlockSpec((1, Hp), const),          # b_p (f32)
        ],
        out_specs=(
            pl.BlockSpec((None, TB, Hp), per_bt),  # h_t stream
            pl.BlockSpec((TB, Hp), per_b),         # final c (resident over t)
        ),
        scratch_shapes=[pltpu.VMEM((TB, Hp), jnp.float32),   # carried h
                        pltpu.VMEM((TB, Hp), jnp.float32)],  # carried c
        compiler_params=pltpu.CompilerParams(
            dimension_semantics=("parallel", "arbitrary"),
            vmem_limit_bytes=_vmem_limit_bytes(),
        ),
        cost_estimate=cost,
    )(x_mm, h0, c0, w_x, w_h, b_all, w_p, b_p)

    h_seq = h_seq_p if Hp == H else h_seq_p[..., :H]
    c_T = c_last_p if Hp == H else c_last_p[:, :H]
    return h_seq, (h_seq[-1], c_T)


def res_lstm_cell(x, hidden, prepared):
    """Single-step forward matching ResLSTMCell.forward: returns (h_t, (h_t, c_t))."""
    h_seq, (h_t, c_t) = res_lstm_sequence(x[None], hidden, prepared)
    return h_seq[0], (h_t, c_t)


# ---------------------------------------------------------------------------
# Pure-JAX references (unfused params) mirroring the PyTorch forward exactly.
# ---------------------------------------------------------------------------
def res_lstm_cell_ref(x, hidden, params, hidden_size):
    batch = x.shape[0]
    input_size = x.shape[1]
    if hidden is None:
        hx = jnp.zeros((batch, hidden_size), x.dtype)
        cx = jnp.zeros((batch, hidden_size), x.dtype)
    else:
        hx, cx = hidden
    gates = (x @ params["w_x2h"].T + params["b_x2h"]
             + hx @ params["w_h2h"].T + params["b_h2h"])
    ingate, forgetgate, cellgate, outgate = jnp.split(gates, 4, axis=1)
    ingate = jax.nn.sigmoid(ingate)
    forgetgate = jax.nn.sigmoid(forgetgate)
    cellgate = jnp.tanh(cellgate)
    outgate = jax.nn.sigmoid(outgate)
    c_t = cx * forgetgate + ingate * cellgate
    r_t = jnp.tanh(c_t)
    m_t = r_t @ params["w_p"].T + params["b_p"]
    if input_size == hidden_size:
        h_t = outgate * (m_t + x)
    else:
        h_t = outgate * (m_t + (x @ params["w_h"].T + params["b_h"]))
    return h_t, (h_t, c_t)


def res_lstm_sequence_ref(x_seq, hidden, params, hidden_size):
    B = x_seq.shape[1]
    if hidden is None:
        hidden = (jnp.zeros((B, hidden_size), x_seq.dtype),
                  jnp.zeros((B, hidden_size), x_seq.dtype))

    def step(carry, x_t):
        h, c = carry
        h_t, (_, c_t) = res_lstm_cell_ref(x_t, (h, c), params, hidden_size)
        return (h_t, c_t), h_t

    (h_T, c_T), h_seq = jax.lax.scan(step, hidden, x_seq)
    return h_seq, (h_T, c_T)


def _assert_close(name, a, b, atol, rtol):
    if not jnp.allclose(a, b, atol=atol, rtol=rtol):
        err = float(jnp.max(jnp.abs(a.astype(jnp.float32) - b.astype(jnp.float32))))
        raise AssertionError(f"{name}: max abs err {err:.3e} (atol={atol}, rtol={rtol})")


if __name__ == "__main__":
    key = jax.random.PRNGKey(0)
    batch, seq_len = 8, 6

    # Exercise: projection residual (I != H), identity residual with H not a
    # multiple of 128 (folded identity block), and the lane-aligned I == H == Hp path.
    for input_size, hidden_size in ((16, 32), (32, 32), (128, 128)):
        kp, kx, kh, kc = jax.random.split(
            jax.random.fold_in(key, 1000 * input_size + hidden_size), 4)
        params = init_res_lstm_params(kp, input_size, hidden_size)
        x_seq = jax.random.normal(kx, (seq_len, batch, input_size), jnp.float32)
        hx = jax.random.normal(kh, (batch, hidden_size), jnp.float32)
        cx = jax.random.normal(kc, (batch, hidden_size), jnp.float32)

        # ---- f32 compute path: tight checks against the pure-JAX reference ----
        prep_f32 = prepare_res_lstm_params(params, input_size, hidden_size,
                                           compute_dtype=jnp.float32)

        # Single step (exact PyTorch forward semantics), explicit hidden state.
        h1, (_, c1) = res_lstm_cell(x_seq[0], (hx, cx), prep_f32)
        h1_r, (_, c1_r) = res_lstm_cell_ref(x_seq[0], (hx, cx), params, hidden_size)
        _assert_close("h1", h1, h1_r, 5e-4, 5e-4)
        _assert_close("c1", c1, c1_r, 5e-4, 5e-4)

        # hidden=None (zero-state) path.
        h0, (_, c0) = res_lstm_cell(x_seq[0], None, prep_f32)
        h0_r, (_, c0_r) = res_lstm_cell_ref(x_seq[0], None, params, hidden_size)
        _assert_close("h0", h0, h0_r, 5e-4, 5e-4)
        _assert_close("c0", c0, c0_r, 5e-4, 5e-4)

        # Fused multi-timestep kernel (weights stay resident across T).
        h_seq, (h_T, c_T) = res_lstm_sequence(x_seq, (hx, cx), prep_f32)
        h_seq_r, (h_T_r, c_T_r) = res_lstm_sequence_ref(x_seq, (hx, cx),
                                                        params, hidden_size)
        _assert_close("h_seq", h_seq, h_seq_r, 5e-4, 5e-4)
        _assert_close("h_T", h_T, h_T_r, 5e-4, 5e-4)
        _assert_close("c_T", c_T, c_T_r, 5e-4, 5e-4)

        # ---- bf16 fast path (default compute dtype): loose smoke check ----
        prep_bf16 = prepare_res_lstm_params(params, input_size, hidden_size)
        h_seq16, (h_T16, c_T16) = res_lstm_sequence(x_seq, (hx, cx), prep_bf16)
        _assert_close("h_seq(bf16)", h_seq16, h_seq_r, 2e-1, 2e-1)
        _assert_close("c_T(bf16)", c_T16, c_T_r, 2e-1, 2e-1)

        jax.block_until_ready((h1, c1, h0, c0, h_seq, h_T, c_T, h_seq16, c_T16))

    print("KERNEL_OK")
</pallas_src>

<mosaic_0001>
module attributes {stable_mosaic.version = 11 : i64} {
  func.func @_res_lstm_seq_kernel(%arg0: i32, %arg1: i32, %arg2: memref<1x8x16xf32, #tpu.memory_space<vmem>>, %arg3: memref<8x128xf32, #tpu.memory_space<vmem>>, %arg4: memref<8x128xf32, #tpu.memory_space<vmem>>, %arg5: memref<16x640xf32, #tpu.memory_space<vmem>>, %arg6: memref<128x512xf32, #tpu.memory_space<vmem>>, %arg7: memref<1x640xf32, #tpu.memory_space<vmem>>, %arg8: memref<128x128xf32, #tpu.memory_space<vmem>>, %arg9: memref<1x128xf32, #tpu.memory_space<vmem>>, %arg10: memref<1x8x128xf32, #tpu.memory_space<vmem>>, %arg11: memref<8x128xf32, #tpu.memory_space<vmem>>, %arg12: memref<8x128xf32, #tpu.memory_space<vmem>>, %arg13: memref<8x128xf32, #tpu.memory_space<vmem>>) attributes {dimension_semantics = [#tpu.dimension_semantics<parallel>, #tpu.dimension_semantics<arbitrary>], iteration_bounds = array<i64: 1, 1>, scalar_prefetch = 0 : i64, scratch_operands = 2 : i64, tpu.core_type = #tpu.core_type<tc>, window_params = [{transform_indices = @transform_0, window_bounds = array<i64: 1, 8, 16>}, {transform_indices = @transform_1, window_bounds = array<i64: 8, 128>}, {transform_indices = @transform_2, window_bounds = array<i64: 8, 128>}, {pipeline_mode = #tpu.pipeline_mode<synchronous>, transform_indices = @transform_3, window_bounds = array<i64: 16, 640>}, {pipeline_mode = #tpu.pipeline_mode<synchronous>, transform_indices = @transform_4, window_bounds = array<i64: 128, 512>}, {pipeline_mode = #tpu.pipeline_mode<synchronous>, transform_indices = @transform_5, window_bounds = array<i64: 1, 640>}, {pipeline_mode = #tpu.pipeline_mode<synchronous>, transform_indices = @transform_6, window_bounds = array<i64: 128, 128>}, {pipeline_mode = #tpu.pipeline_mode<synchronous>, transform_indices = @transform_7, window_bounds = array<i64: 1, 128>}, {transform_indices = @transform_8, window_bounds = array<i64: 1, 8, 128>}, {transform_indices = @transform_9, window_bounds = array<i64: 8, 128>}]} {
    %c0_i32 = arith.constant 0 : i32
    %0 = arith.cmpi eq, %arg1, %c0_i32 : i32
    %1 = arith.extui %0 : i1 to i32
    %c0_i32_0 = arith.constant 0 : i32
    %2 = arith.cmpi ne, %1, %c0_i32_0 : i32
    scf.if %2 {
      %c0_37 = arith.constant 0 : index
      %c0_38 = arith.constant 0 : index
      %60 = vector.load %arg3[%c0_37, %c0_38] : memref<8x128xf32, #tpu.memory_space<vmem>>, vector<8x128xf32>
      %c0_39 = arith.constant 0 : index
      %c0_40 = arith.constant 0 : index
      %61 = vector.load %arg12[%c0_39, %c0_40] : memref<8x128xf32, #tpu.memory_space<vmem>>, vector<8x128xf32>
      tpu.vector_store %arg12[%c0_39, %c0_40], %60 {strides = array<i32>} : memref<8x128xf32, #tpu.memory_space<vmem>>, vector<8x128xf32>,
      %c0_41 = arith.constant 0 : index
      %c0_42 = arith.constant 0 : index
      %62 = vector.load %arg4[%c0_41, %c0_42] : memref<8x128xf32, #tpu.memory_space<vmem>>, vector<8x128xf32>
      %c0_43 = arith.constant 0 : index
      %c0_44 = arith.constant 0 : index
      %63 = vector.load %arg13[%c0_43, %c0_44] : memref<8x128xf32, #tpu.memory_space<vmem>>, vector<8x128xf32>
      tpu.vector_store %arg13[%c0_43, %c0_44], %62 {strides = array<i32>} : memref<8x128xf32, #tpu.memory_space<vmem>>, vector<8x128xf32>,
    } else {
    }
    %c0 = arith.constant 0 : index
    %c0_1 = arith.constant 0 : index
    %c0_2 = arith.constant 0 : index
    %3 = vector.load %arg2[%c0, %c0_1, %c0_2] : memref<1x8x16xf32, #tpu.memory_space<vmem>>, vector<1x8x16xf32>
    %4 = vector.shape_cast %3 : vector<1x8x16xf32> to vector<8x16xf32>
    %c0_3 = arith.constant 0 : index
    %c0_4 = arith.constant 0 : index
    %5 = vector.load %arg12[%c0_3, %c0_4] : memref<8x128xf32, #tpu.memory_space<vmem>>, vector<8x128xf32>
    %c0_5 = arith.constant 0 : index
    %c0_6 = arith.constant 0 : index
    %6 = vector.load %arg13[%c0_5, %c0_6] : memref<8x128xf32, #tpu.memory_space<vmem>>, vector<8x128xf32>
    %c0_7 = arith.constant 0 : index
    %c0_8 = arith.constant 0 : index
    %7 = vector.load %arg5[%c0_7, %c0_8] : memref<16x640xf32, #tpu.memory_space<vmem>>, vector<16x640xf32>
    %cst = arith.constant dense<0.000000e+00> : vector<8x640xf32>
    %8 = tpu.matmul %4, %7, %cst {dimension_numbers = #tpu.dot_dimension_numbers<[1], [0], [0], [1], [0, 0, 1, 1], [], []>} : vector<8x16xf32>, vector<16x640xf32>, vector<8x640xf32> -> vector<8x640xf32>
    %c0_9 = arith.constant 0 : index
    %c0_10 = arith.constant 0 : index
    %9 = vector.load %arg7[%c0_9, %c0_10] : memref<1x640xf32, #tpu.memory_space<vmem>>, vector<1x640xf32>
    %10 = vector.broadcast %9 : vector<1x640xf32> to vector<8x640xf32>
    %11 = arith.addf %8, %10 : vector<8x640xf32>
    %12 = vector.extract_strided_slice %11 {offsets = [0, 0], sizes = [8, 512], strides = [1, 1]} : vector<8x640xf32> to vector<8x512xf32>
    %c0_11 = arith.constant 0 : index
    %c0_12 = arith.constant 0 : index
    %13 = vector.load %arg6[%c0_11, %c0_12] : memref<128x512xf32, #tpu.memory_space<vmem>>, vector<128x512xf32>
    %cst_13 = arith.constant dense<0.000000e+00> : vector<8x512xf32>
    %14 = tpu.matmul %5, %13, %cst_13 {dimension_numbers = #tpu.dot_dimension_numbers<[1], [0], [0], [1], [0, 0, 1, 1], [], []>} : vector<8x128xf32>, vector<128x512xf32>, vector<8x512xf32> -> vector<8x512xf32>
    %15 = arith.addf %12, %14 : vector<8x512xf32>
    %16 = vector.extract_strided_slice %15 {offsets = [0, 0], sizes = [8, 128], strides = [1, 1]} : vector<8x512xf32> to vector<8x128xf32>
    %cst_14 = arith.constant 5.000000e-01 : f32
    %17 = vector.broadcast %cst_14 : f32 to vector<8x128xf32>
    %18 = arith.mulf %17, %16 : vector<8x128xf32>
    %19 = math.tanh %18 : vector<8x128xf32>
    %cst_15 = arith.constant 1.000000e+00 : f32
    %20 = vector.broadcast %cst_15 : f32 to vector<8x128xf32>
    %21 = arith.addf %20, %19 : vector<8x128xf32>
    %cst_16 = arith.constant 5.000000e-01 : f32
    %22 = vector.broadcast %cst_16 : f32 to vector<8x128xf32>
    %23 = arith.mulf %22, %21 : vector<8x128xf32>
    %24 = vector.extract_strided_slice %15 {offsets = [0, 128], sizes = [8, 128], strides = [1, 1]} : vector<8x512xf32> to vector<8x128xf32>
    %cst_17 = arith.constant 5.000000e-01 : f32
    %25 = vector.broadcast %cst_17 : f32 to vector<8x128xf32>
    %26 = arith.mulf %25, %24 : vector<8x128xf32>
    %27 = math.tanh %26 : vector<8x128xf32>
    %cst_18 = arith.constant 1.000000e+00 : f32
    %28 = vector.broadcast %cst_18 : f32 to vector<8x128xf32>
    %29 = arith.addf %28, %27 : vector<8x128xf32>
    %cst_19 = arith.constant 5.000000e-01 : f32
    %30 = vector.broadcast %cst_19 : f32 to vector<8x128xf32>
    %31 = arith.mulf %30, %29 : vector<8x128xf32>
    %32 = vector.extract_strided_slice %15 {offsets = [0, 256], sizes = [8, 128], strides = [1, 1]} : vector<8x512xf32> to vector<8x128xf32>
    %33 = math.tanh %32 : vector<8x128xf32>
    %34 = vector.extract_strided_slice %15 {offsets = [0, 384], sizes = [8, 128], strides = [1, 1]} : vector<8x512xf32> to vector<8x128xf32>
    %cst_20 = arith.constant 5.000000e-01 : f32
    %35 = vector.broadcast %cst_20 : f32 to vector<8x128xf32>
    %36 = arith.mulf %35, %34 : vector<8x128xf32>
    %37 = math.tanh %36 : vector<8x128xf32>
    %cst_21 = arith.constant 1.000000e+00 : f32
    %38 = vector.broadcast %cst_21 : f32 to vector<8x128xf32>
    %39 = arith.addf %38, %37 : vector<8x128xf32>
    %cst_22 = arith.constant 5.000000e-01 : f32
    %40 = vector.broadcast %cst_22 : f32 to vector<8x128xf32>
    %41 = arith.mulf %40, %39 : vector<8x128xf32>
    %42 = arith.mulf %6, %31 : vector<8x128xf32>
    %43 = arith.mulf %23, %33 : vector<8x128xf32>
    %44 = arith.addf %42, %43 : vector<8x128xf32>
    %45 = math.tanh %44 : vector<8x128xf32>
    %c0_23 = arith.constant 0 : index
    %c0_24 = arith.constant 0 : index
    %46 = vector.load %arg8[%c0_23, %c0_24] : memref<128x128xf32, #tpu.memory_space<vmem>>, vector<128x128xf32>
    %cst_25 = arith.constant dense<0.000000e+00> : vector<8x128xf32>
    %47 = tpu.matmul %45, %46, %cst_25 {dimension_numbers = #tpu.dot_dimension_numbers<[1], [0], [0], [1], [0, 0, 1, 1], [], []>} : vector<8x128xf32>, vector<128x128xf32>, vector<8x128xf32> -> vector<8x128xf32>
    %c0_26 = arith.constant 0 : index
    %c0_27 = arith.constant 0 : index
    %48 = vector.load %arg9[%c0_26, %c0_27] : memref<1x128xf32, #tpu.memory_space<vmem>>, vector<1x128xf32>
    %49 = vector.broadcast %48 : vector<1x128xf32> to vector<8x128xf32>
    %50 = arith.addf %47, %49 : vector<8x128xf32>
    %51 = vector.extract_strided_slice %11 {offsets = [0, 512], sizes = [8, 128], strides = [1, 1]} : vector<8x640xf32> to vector<8x128xf32>
    %52 = arith.addf %50, %51 : vector<8x128xf32>
    %53 = arith.mulf %41, %52 : vector<8x128xf32>
    %c0_28 = arith.constant 0 : index
    %c0_29 = arith.constant 0 : index
    %54 = vector.load %arg12[%c0_28, %c0_29] : memref<8x128xf32, #tpu.memory_space<vmem>>, vector<8x128xf32>
    tpu.vector_store %arg12[%c0_28, %c0_29], %53 {strides = array<i32>} : memref<8x128xf32, #tpu.memory_space<vmem>>, vector<8x128xf32>,
    %c0_30 = arith.constant 0 : index
    %c0_31 = arith.constant 0 : index
    %55 = vector.load %arg13[%c0_30, %c0_31] : memref<8x128xf32, #tpu.memory_space<vmem>>, vector<8x128xf32>
    tpu.vector_store %arg13[%c0_30, %c0_31], %44 {strides = array<i32>} : memref<8x128xf32, #tpu.memory_space<vmem>>, vector<8x128xf32>,
    %c0_32 = arith.constant 0 : index
    %c0_33 = arith.constant 0 : index
    %c0_34 = arith.constant 0 : index
    %56 = vector.load %arg10[%c0_32, %c0_33, %c0_34] : memref<1x8x128xf32, #tpu.memory_space<vmem>>, vector<1x8x128xf32>
    %57 = vector.shape_cast %56 : vector<1x8x128xf32> to vector<8x128xf32>
    %58 = vector.shape_cast %53 : vector<8x128xf32> to vector<1x8x128xf32>
    tpu.vector_store %arg10[%c0_32, %c0_33, %c0_34], %58 {strides = array<i32>} : memref<1x8x128xf32, #tpu.memory_space<vmem>>, vector<1x8x128xf32>,
    %c0_35 = arith.constant 0 : index
    %c0_36 = arith.constant 0 : index
    %59 = vector.load %arg11[%c0_35, %c0_36] : memref<8x128xf32, #tpu.memory_space<vmem>>, vector<8x128xf32>
    tpu.vector_store %arg11[%c0_35, %c0_36], %44 {strides = array<i32>} : memref<8x128xf32, #tpu.memory_space<vmem>>, vector<8x128xf32>,
    return
  }
  func.func @transform_0(%arg0: i32, %arg1: i32) -> (i32, i32, i32) {
    %c0_i32 = arith.constant 0 : i32
    %c0_i32_0 = arith.constant 0 : i32
    return %arg1, %arg0, %c0_i32 : i32, i32, i32
  }
  func.func @transform_1(%arg0: i32, %arg1: i32) -> (i32, i32) {
    %c0_i32 = arith.constant 0 : i32
    %c0_i32_0 = arith.constant 0 : i32
    return %arg0, %c0_i32 : i32, i32
  }
  func.func @transform_2(%arg0: i32, %arg1: i32) -> (i32, i32) {
    %c0_i32 = arith.constant 0 : i32
    %c0_i32_0 = arith.constant 0 : i32
    return %arg0, %c0_i32 : i32, i32
  }
  func.func @transform_3(%arg0: i32, %arg1: i32) -> (i32, i32) {
    %c0_i32 = arith.constant 0 : i32
    %c0_i32_0 = arith.constant 0 : i32
    %c0_i32_1 = arith.constant 0 : i32
    return %c0_i32, %c0_i32_0 : i32, i32
  }
  func.func @transform_4(%arg0: i32, %arg1: i32) -> (i32, i32) {
    %c0_i32 = arith.constant 0 : i32
    %c0_i32_0 = arith.constant 0 : i32
    %c0_i32_1 = arith.constant 0 : i32
    return %c0_i32, %c0_i32_0 : i32, i32
  }
  func.func @transform_5(%arg0: i32, %arg1: i32) -> (i32, i32) {
    %c0_i32 = arith.constant 0 : i32
    %c0_i32_0 = arith.constant 0 : i32
    %c0_i32_1 = arith.constant 0 : i32
    return %c0_i32, %c0_i32_0 : i32, i32
  }
  func.func @transform_6(%arg0: i32, %arg1: i32) -> (i32, i32) {
    %c0_i32 = arith.constant 0 : i32
    %c0_i32_0 = arith.constant 0 : i32
    %c0_i32_1 = arith.constant 0 : i32
    return %c0_i32, %c0_i32_0 : i32, i32
  }
  func.func @transform_7(%arg0: i32, %arg1: i32) -> (i32, i32) {
    %c0_i32 = arith.constant 0 : i32
    %c0_i32_0 = arith.constant 0 : i32
    %c0_i32_1 = arith.constant 0 : i32
    return %c0_i32, %c0_i32_0 : i32, i32
  }
  func.func @transform_8(%arg0: i32, %arg1: i32) -> (i32, i32, i32) {
    %c0_i32 = arith.constant 0 : i32
    %c0_i32_0 = arith.constant 0 : i32
    return %arg1, %arg0, %c0_i32 : i32, i32, i32
  }
  func.func @transform_9(%arg0: i32, %arg1: i32) -> (i32, i32) {
    %c0_i32 = arith.constant 0 : i32
    %c0_i32_0 = arith.constant 0 : i32
    return %arg0, %c0_i32 : i32, i32
  }
}

</mosaic_0001>

<bundles_post_ra>
// kernel: tpu_custom_call.1
= control target key start
LH: loop header
LB: loop body
LE: loop exit
PB: predicated region body
PF: predicated region fallthrough
CT: control target
= control target key end

     0   :  { %15 = vsyncpa [#allocation5], 0  ;;  %s1326_s0 = inlined_call_operand.hbm [shape: f32[1,8,16], index: 0, kind: input, shape index: {}]   ;;  %s1327_s1 = inlined_call_operand.hbm [shape: f32[8,128], index: 1, kind: input, shape index: {}]   ;;  %s1328_s2 = inlined_call_operand.hbm [shape: f32[8,128], index: 2, kind: input, shape index: {}]   ;;  %s1329_s3 = inlined_call_operand.hbm [shape: f32[16,640], index: 3, kind: input, shape index: {}]   ;;  %s1330_s4 = inlined_call_operand.hbm [shape: f32[128,512], index: 4, kind: input, shape index: {}]   ;;  %s1331_s5 = inlined_call_operand.vmem [shape: f32[1,640], index: 5, kind: input, shape index: {}]   ;;  %s1332_s6 = inlined_call_operand.hbm [shape: f32[128,128], index: 6, kind: input, shape index: {}]   ;;  %s1333_s7 = inlined_call_operand.vmem [shape: f32[1,128], index: 7, kind: input, shape index: {}]   ;;  %s1334_s8 = inlined_call_operand.hbm [shape: f32[1,8,128], index: 8, kind: output, shape index: {0}]   ;;  %s1335_s9 = inlined_call_operand.hbm [shape: f32[8,128], index: 9, kind: output, shape index: {1}]  }
   0x1   :  { %16 = vsyncpa [#allocation8], 0 }
   0x2   :  { %17 = vsyncpa [#allocation11], 0 }
   0x3   :  { %18 = vsyncpa [#allocation14], 0 }
   0x4   :  { %19 = vsyncpa [#allocation6], 0 }
   0x5   :  { %20 = vsyncpa [#allocation17], 0  ;;  %s1122_s30 = smov [#allocation7]   ;;  %s1123_s11 = smov [#allocation10]  }
   0x6   :  { %s37_s10 = sshll.u32 %s1122_s30, 4  ;;  %s56_s12 = sshll.u32 %s1123_s11, 4  ;;  %s38_s10 = int_to_ptr.vmem [resolvable:$true] %s37_s10  ;;  %s1189_s12 = int_to_ptr.vmem [resolvable:$true] %s56_s12 }
   0x7   :  { %s934_s15 = scalar_lea.hbm %s1327_s1, 128 }
   0x8   :  { %p935_p0 = scmp.ne.s32.totalorder %s1327_s1, %s934_s15  ;;  %p938_p1 = scmp.lt.u32.totalorder %s934_s15, %s1327_s1 }
   0xa   :  { %p940_p2 = pnand %p938_p1, %p935_p0 }
   0xc   :  { %943 = shalt.err (!%p940_p2)
}
   0xd   :  { %s944_s20 = scalar_lea.vmem %s38_s10, 128  ;;  %p949_p4 = scmp.lt.s32.totalorder %s38_s10, %s38_s10 }
   0xe   :  { %p945_p3 = scmp.ne.s32.totalorder %s38_s10, %s944_s20  ;;  %p950_p5 = scmp.lt.s32.totalorder %s944_s20, %s944_s20 }
  0x10   :  { %p951_p6 = por %p950_p5, %p949_p4 }
  0x12   :  { %p952_p7 = pnand %p951_p6, %p945_p3 }
  0x14   :  { %955 = shalt.err (!%p952_p7)
}
  0x15   :  { %40 = dma.hbm_to_vmem [thread:$0]  %s1327_s1, 128, %s38_s10, [#allocation8]  }
  0x16   :  { %s956_s25 = scalar_lea.hbm %s1329_s3, 1280 }
  0x17   :  { %p957_p8 = scmp.ne.s32.totalorder %s1329_s3, %s956_s25  ;;  %p960_p9 = scmp.lt.u32.totalorder %s956_s25, %s1329_s3 }
  0x19   :  { %p962_p10 = pnand %p960_p9, %p957_p8 }
  0x1b   :  { %965 = shalt.err (!%p962_p10)
}
  0x1c   :  { %s966_s30 = scalar_lea.vmem %s1189_s12, 1280  ;;  %p971_p12 = scmp.lt.s32.totalorder %s1189_s12, %s1189_s12 }
  0x1d   :  { %p967_p11 = scmp.ne.s32.totalorder %s1189_s12, %s966_s30  ;;  %p972_p13 = scmp.lt.s32.totalorder %s966_s30, %s966_s30 }
  0x1f   :  { %p973_p0 = por %p972_p13, %p971_p12 }
  0x21   :  { %p974_p1 = pnand %p973_p0, %p967_p11 }
  0x23   :  { %977 = shalt.err (!%p974_p1)
}
  0x24   :  { %s1124_s1 = smov 640   ;;  %s1125_s10 = smov 40  }
  0x25   :  { %62 = dma.hbm_to_vmem [thread:$0]  %s1329_s3, 1280, %s1189_s12, [#allocation11], %s1124_s1, %s1124_s1, %s1125_s10  }
  0x26   :  { %s1126_s14 = smov [#allocation4]   ;;  %s1127_s16 = smov [#allocation9]  }
  0x27   :  { %s27_s15 = sshll.u32 %s1126_s14, 4  ;;  %s47_s17 = sshll.u32 %s1127_s16, 4  ;;  %s28_s15 = int_to_ptr.vmem [resolvable:$true] %s27_s15  ;;  %s48_s17 = int_to_ptr.vmem [resolvable:$true] %s47_s17 }
  0x28   :  { %s978_s20 = scalar_lea.hbm %s1326_s0, 128 }
  0x29   :  { %p979_p2 = scmp.ne.s32.totalorder %s1326_s0, %s978_s20  ;;  %p982_p3 = scmp.lt.u32.totalorder %s978_s20, %s1326_s0 }
  0x2b   :  { %p984_p4 = pnand %p982_p3, %p979_p2 }
  0x2d   :  { %987 = shalt.err (!%p984_p4)
}
  0x2e   :  { %s988_s3 = scalar_lea.vmem %s28_s15, 128  ;;  %p993_p6 = scmp.lt.s32.totalorder %s28_s15, %s28_s15 }
  0x2f   :  { %p989_p5 = scmp.ne.s32.totalorder %s28_s15, %s988_s3  ;;  %p994_p7 = scmp.lt.s32.totalorder %s988_s3, %s988_s3 }
  0x31   :  { %p995_p8 = por %p994_p7, %p993_p6 }
  0x33   :  { %p996_p9 = pnand %p995_p8, %p989_p5 }
  0x35   :  { %999 = shalt.err (!%p996_p9)
}
  0x36   :  { %30 = dma.hbm_to_vmem [thread:$0]  %s1326_s0, 128, %s28_s15, [#allocation5]  }
  0x37   :  { %s1000_s28 = scalar_lea.hbm %s1328_s2, 128 }
  0x38   :  { %p1001_p10 = scmp.ne.s32.totalorder %s1328_s2, %s1000_s28  ;;  %p1004_p11 = scmp.lt.u32.totalorder %s1000_s28, %s1328_s2 }
  0x3a   :  { %p1006_p12 = pnand %p1004_p11, %p1001_p10 }
  0x3c   :  { %1009 = shalt.err (!%p1006_p12)
}
  0x3d   :  { %s1010_s11 = scalar_lea.vmem %s48_s17, 128  ;;  %p1015_p0 = scmp.lt.s32.totalorder %s48_s17, %s48_s17 }
  0x3e   :  { %p1011_p13 = scmp.ne.s32.totalorder %s48_s17, %s1010_s11  ;;  %p1016_p1 = scmp.lt.s32.totalorder %s1010_s11, %s1010_s11 }
  0x40   :  { %p1017_p2 = por %p1016_p1, %p1015_p0 }
  0x42   :  { %p1018_p3 = pnand %p1017_p2, %p1011_p13 }
  0x44   :  { %1021 = shalt.err (!%p1018_p3)
}
  0x45   :  { %50 = dma.hbm_to_vmem [thread:$0]  %s1328_s2, 128, %s48_s17, [#allocation8]  }
  0x46   :  { %s1128_s14 = smov [#allocation12]   ;;  %s1022_s19 = scalar_lea.hbm %s1330_s4, 8192 }
  0x47   :  { %s68_s15 = sshll.u32 %s1128_s14, 4  ;;  %p1023_p4 = scmp.ne.s32.totalorder %s1330_s4, %s1022_s19  ;;  %s69_s15 = int_to_ptr.vmem [resolvable:$true] %s68_s15 }
  0x48   :  { %p1026_p5 = scmp.lt.u32.totalorder %s1022_s19, %s1330_s4 }
  0x4a   :  { %p1028_p6 = pnand %p1026_p5, %p1023_p4 }
  0x4c   :  { %1031 = shalt.err (!%p1028_p6)
}
  0x4d   :  { %s1032_s24 = scalar_lea.vmem %s69_s15, 8192  ;;  %p1037_p8 = scmp.lt.s32.totalorder %s69_s15, %s69_s15 }
  0x4e   :  { %p1033_p7 = scmp.ne.s32.totalorder %s69_s15, %s1032_s24  ;;  %p1038_p9 = scmp.lt.s32.totalorder %s1032_s24, %s1032_s24 }
  0x50   :  { %p1039_p10 = por %p1038_p9, %p1037_p8 }
  0x52   :  { %p1040_p11 = pnand %p1039_p10, %p1033_p7 }
  0x54   :  { %1043 = shalt.err (!%p1040_p11)
}
  0x55   :  { %s1129_s2 = smov 512   ;;  %s1130_s17 = smov 32  }
  0x56   :  { %74 = dma.hbm_to_vmem [thread:$0]  %s1330_s4, 8192, %s69_s15, [#allocation11], %s1129_s2, %s1129_s2, %s1130_s17  }
  0x57   :  { %s1131_s25 = smov [#allocation13]   ;;  %s1044_s29 = scalar_lea.hbm %s1332_s6, 2048 }
  0x58   :  { %s82_s26 = sshll.u32 %s1131_s25, 4  ;;  %p1045_p12 = scmp.ne.s32.totalorder %s1332_s6, %s1044_s29  ;;  %s83_s26 = int_to_ptr.vmem [resolvable:$true] %s82_s26 }
  0x59   :  { %p1048_p13 = scmp.lt.u32.totalorder %s1044_s29, %s1332_s6 }
  0x5b   :  { %p1050_p0 = pnand %p1048_p13, %p1045_p12 }
  0x5d   :  { %1053 = shalt.err (!%p1050_p0)
}
  0x5e   :  { %s1054_s0 = scalar_lea.vmem %s83_s26, 2048  ;;  %p1059_p2 = scmp.lt.s32.totalorder %s83_s26, %s83_s26 }
  0x5f   :  { %p1055_p1 = scmp.ne.s32.totalorder %s83_s26, %s1054_s0  ;;  %p1060_p3 = scmp.lt.s32.totalorder %s1054_s0, %s1054_s0 }
  0x61   :  { %p1061_p4 = por %p1060_p3, %p1059_p2 }
  0x63   :  { %p1062_p5 = pnand %p1061_p4, %p1055_p1 }
  0x65   :  { %1065 = shalt.err (!%p1062_p5)
}
  0x66   :  { %s1132_s4 = smov 128   ;;  %s1133_s13 = smov 8  }
  0x67   :  { %88 = dma.hbm_to_vmem [thread:$0]  %s1332_s6, 2048, %s83_s26, [#allocation14], %s1132_s4, %s1132_s4, %s1133_s13  }
  0x68   :  { %1110 = dma.done.wait [#allocation5], 128  }
  0x69   :  { %1111 = vsyncadd [#allocation5], 4294967168 }
  0x6a   :  { %1112 = dma.done.wait [#allocation8], 256  }
  0x6b   :  { %1113 = vsyncadd [#allocation8], 4294967040 }
  0x6c   :  { %1114 = dma.done.wait [#allocation11], 9472  }
  0x6d   :  { %1115 = vsyncadd [#allocation11], 4294957824 }
  0x6e   :  { %1116 = dma.done.wait [#allocation14], 2048  }
  0x6f   :  { %1117 = vsyncadd [#allocation14], 4294965248  ;;  %v1134_v0 = vmov 0.0   ;;  %v121_v1 = vld [vmem:[#allocation10 + $0x8] sm:$0xff]  ;;  %v126_v2 = vld [vmem:[#allocation10 + $0x30] sm:$0xff]  ;;  %vm157_vm0 = vcmask 130048  }
  0x70   :  { %225 = vmatprep.mubr.f32.mxu1 %v1134_v0  ;;  %501 = vmatprep.mubr.f32.mxu0 %v1134_v0  ;;  %v374_v3 = vld [vmem:[#allocation12 + $0x8] sm:$0xff]  ;;  %v797_v4 = vpack.c.bf16 %v126_v2, %v121_v1  ;;  %v120_v6 = vld [vmem:[#allocation10] sm:$0xff]  ;;  %v125_v7 = vld [vmem:[#allocation10 + $0x28] sm:$0xff]  ;;  %v1135_v38 = vmov 0.0|0.0   ;;  %vm1136_vm1 = vmmov 0  }
  0x71   :  { %v378_v5 = vld [vmem:[#allocation12 + $0x28] sm:$0xff]  ;;  %v799_v9 = vpack.c.bf16 %v125_v7, %v120_v6  ;;  %v373_v10 = vld [vmem:[#allocation12] sm:$0xff]  ;;  %v1270_v12 = vld [vmem:[#allocation4] sm:$0xff] }
  0x72   :  { %v808_v8 = vpack.c.bf16 %v378_v5, %v374_v3  ;;  %v377_v11 = vld [vmem:[#allocation12 + $0x20] sm:$0xff]  ;;  %798 = vmatprep.subr.bf16.mxu1 %v797_v4  ;;  %v123_v14 = vld [vmem:[#allocation10 + $0x18] sm:$0xff]  ;;  %v128_v15 = vld [vmem:[#allocation10 + $0x40] sm:$0xff] }
  0x73   :  { %v810_v13 = vpack.c.bf16 %v377_v11, %v373_v10  ;;  %v382_v16 = vld [vmem:[#allocation12 + $0x48] sm:$0xff]  ;;  %800 = vmatpush1.bf16.msra.mxu1 %v799_v9  ;;  %v801_v17 = vpack.c.bf16 %v128_v15, %v123_v14  ;;  %v122_v19 = vld [vmem:[#allocation10 + $0x10] sm:$0xff]  ;;  %v124_v28 = vld [vmem:[#allocation10 + $0x20] sm:$0xff] }
  0x74   :  { %809 = vmatprep.subr.bf16.mxu0 %v808_v8  ;;  %v386_v18 = vld [vmem:[#allocation12 + $0x68] sm:$0xff]  ;;  %v381_v23 = vld [vmem:[#allocation12 + $0x40] sm:$0xff]  ;;  %v129_v29 = vld [vmem:[#allocation10 + $0x48] sm:$0xff] }
  0x75   :  { %v127_v20 = vld [vmem:[#allocation10 + $0x38] sm:$0xff]  ;;  %811 = vmatpush1.bf16.msra.mxu0 %v810_v13  ;;  %v812_v21 = vpack.c.bf16 %v386_v18, %v382_v16  ;;  %v385_v24 = vld [vmem:[#allocation12 + $0x60] sm:$0xff]  ;;  %802 = vmatprep.subr.bf16.mxu1 %v801_v17  ;;  %v806_v34 = vpack.c.bf16 %v129_v29, %v124_v28  ;;  %v376_v36 = vld [vmem:[#allocation12 + $0x18] sm:$0xff] }
  0x76   :  { %v803_v22 = vpack.c.bf16 %v127_v20, %v122_v19  ;;  %v390_v25 = vld [vmem:[#allocation12 + $0x88] sm:$0xff]  ;;  %v814_v26 = vpack.c.bf16 %v385_v24, %v381_v23  ;;  %731 = vmatmul.mubr.msk.f32.vlgmr.msra.gmra.mrb[0].mxu1 %vm157_vm0, %v1270_v12  ;;  %v389_v31 = vld [vmem:[#allocation12 + $0x80] sm:$0xff]  ;;  %v380_v37 = vld [vmem:[#allocation12 + $0x38] sm:$0xff] }
  0x77   :  { %v394_v27 = vld [vmem:[#allocation12 + $0xa8] sm:$0xff]  ;;  %813 = vmatprep.subr.bf16.mxu0 %v812_v21  ;;  %v393_v32 = vld [vmem:[#allocation12 + $0xa0] sm:$0xff]  ;;  %296 = vmatprep.mubr.f32.mxu1 %v1134_v0  ;;  %v840_v40 = vpack.c.bf16 %v380_v37, %v376_v36  ;;  %v375_v42 = vld [vmem:[#allocation12 + $0x10] sm:$0xff] }
  0x78   :  { %v816_v30 = vpack.c.bf16 %v394_v27, %v390_v25  ;;  %v398_v33 = vld [vmem:[#allocation12 + $0xc8] sm:$0xff]  ;;  %804 = vmatpush1.bf16.msra.mxu1 %v803_v22  ;;  %v818_v39 = vpack.c.bf16 %v393_v32, %v389_v31  ;;  %v397_v41 = vld [vmem:[#allocation12 + $0xc0] sm:$0xff]  ;;  %v379_v45 = vld [vmem:[#allocation12 + $0x30] sm:$0xff] }
  0x79   :  { %v402_v35 = vld [vmem:[#allocation12 + $0xe8] sm:$0xff]  ;;  %815 = vmatpush1.bf16.msra.mxu0 %v814_v26  ;;  %805 = vmatprep.subr.bf16.mxu1 %v1135_v38  ;;  %v401_v44 = vld [vmem:[#allocation12 + $0xe0] sm:$0xff]  ;;  %v384_v48 = vld [vmem:[#allocation12 + $0x58] sm:$0xff]  ;;  %v842_v50 = vpack.c.bf16 %v379_v45, %v375_v42 }
  0x7a   :  { %817 = vmatprep.subr.bf16.mxu0 %v816_v30  ;;  %v820_v43 = vpack.c.bf16 %v402_v35, %v398_v33  ;;  %v406_v46 = vld [vmem:[#allocation12 + $0x108] sm:$0xff]  ;;  %v388_v49 = vld [vmem:[#allocation12 + $0x78] sm:$0xff]  ;;  %v822_v51 = vpack.c.bf16 %v401_v44, %v397_v41  ;;  %v405_v53 = vld [vmem:[#allocation12 + $0x100] sm:$0xff] }
  0x7b   :  { %732 = vmatmul.mubr.msk.f32.vlgmr.msra.gmra.mrb[2].mxu1 %vm157_vm0, %v1270_v12  ;;  %v410_v47 = vld [vmem:[#allocation12 + $0x128] sm:$0xff]  ;;  %v844_v52 = vpack.c.bf16 %v388_v49, %v384_v48  ;;  %v383_v54 = vld [vmem:[#allocation12 + $0x50] sm:$0xff]  ;;  %v409_v57 = vld [vmem:[#allocation12 + $0x120] sm:$0xff] }
  0x7c   :  { %807 = vmatpush3.bf16.msra.mxu1 %v806_v34  ;;  %759 = vmatprep.mubr.msk.f32.mxu1 %vm1136_vm1, %v1134_v0  ;;  %v387_v55 = vld [vmem:[#allocation12 + $0x70] sm:$0xff]  ;;  %v824_v56 = vpack.c.bf16 %v410_v47, %v406_v46  ;;  %v392_v58 = vld [vmem:[#allocation12 + $0x98] sm:$0xff]  ;;  %v414_v60 = vld [vmem:[#allocation12 + $0x148] sm:$0xff]  ;;  %v826_v63 = vpack.c.bf16 %v409_v57, %v405_v53 }
  0x7d   :  { %819 = vmatpush1.bf16.msra.mxu0 %v818_v39  ;;  %841 = vmatprep.subr.bf16.mxu1 %v840_v40  ;;  %v396_v59 = vld [vmem:[#allocation12 + $0xb8] sm:$0xff]  ;;  %v418_v61 = vld [vmem:[#allocation12 + $0x168] sm:$0xff]  ;;  %v846_v62 = vpack.c.bf16 %v387_v55, %v383_v54  ;;  %v413_v2 = vld [vmem:[#allocation12 + $0x140] sm:$0xff] }
  0x7e   :  { %821 = vmatprep.subr.bf16.mxu0 %v820_v43  ;;  %v848_v1 = vpack.c.bf16 %v396_v59, %v392_v58  ;;  %v391_v3 = vld [vmem:[#allocation12 + $0x90] sm:$0xff]  ;;  %v828_v5 = vpack.c.bf16 %v418_v61, %v414_v60  ;;  %v417_v6 = vld [vmem:[#allocation12 + $0x160] sm:$0xff]  ;;  %v400_v7 = vld [vmem:[#allocation12 + $0xd8] sm:$0xff] }
  0x7f   :  { %760 = vmatmul.mubr.msk.f32.vlgmr.msra.gmra.mrb[4].mxu1 %vm157_vm0, %v1270_v12  ;;  %v395_v4 = vld [vmem:[#allocation12 + $0xb0] sm:$0xff]  ;;  %v404_v8 = vld [vmem:[#allocation12 + $0xf8] sm:$0xff]  ;;  %v422_v9 = vld [vmem:[#allocation12 + $0x188] sm:$0xff]  ;;  %v830_v12 = vpack.c.bf16 %v417_v6, %v413_v2 }
  0x80   :  { %843 = vmatpush1.bf16.msra.mxu1 %v842_v50  ;;  %572 = vmatprep.mubr.f32.mxu1 %v1134_v0  ;;  %v426_v10 = vld [vmem:[#allocation12 + $0x1a8] sm:$0xff]  ;;  %v850_v11 = vpack.c.bf16 %v395_v4, %v391_v3  ;;  %v852_v13 = vpack.c.bf16 %v404_v8, %v400_v7  ;;  %v421_v14 = vld [vmem:[#allocation12 + $0x180] sm:$0xff]  ;;  %v399_v15 = vld [vmem:[#allocation12 + $0xd0] sm:$0xff] }
  0x81   :  { %823 = vmatpush1.bf16.msra.mxu0 %v822_v51  ;;  %845 = vmatprep.subr.bf16.mxu1 %v844_v52  ;;  %v403_v16 = vld [vmem:[#allocation12 + $0xf0] sm:$0xff]  ;;  %v832_v17 = vpack.c.bf16 %v426_v10, %v422_v9  ;;  %v425_v18 = vld [vmem:[#allocation12 + $0x1a0] sm:$0xff]  ;;  %v408_v19 = vld [vmem:[#allocation12 + $0x118] sm:$0xff] }
  0x82   :  { %825 = vmatprep.subr.bf16.mxu0 %v824_v56  ;;  %v412_v20 = vld [vmem:[#allocation12 + $0x138] sm:$0xff]  ;;  %v430_v21 = vld [vmem:[#allocation12 + $0x1c8] sm:$0xff]  ;;  %v854_v23 = vpack.c.bf16 %v403_v16, %v399_v15  ;;  %v834_v24 = vpack.c.bf16 %v425_v18, %v421_v14  ;;  %v429_v26 = vld [vmem:[#allocation12 + $0x1c0] sm:$0xff] }
  0x83   :  { %v434_v22 = vld [vmem:[#allocation12 + $0x1e8] sm:$0xff]  ;;  %v856_v25 = vpack.c.bf16 %v412_v20, %v408_v19  ;;  %v407_v27 = vld [vmem:[#allocation12 + $0x110] sm:$0xff]  ;;  %v433_v30 = vld [vmem:[#allocation12 + $0x1e0] sm:$0xff] }
  0x84   :  { %847 = vmatpush1.bf16.msra.mxu1 %v846_v62  ;;  %v411_v28 = vld [vmem:[#allocation12 + $0x130] sm:$0xff]  ;;  %v836_v29 = vpack.c.bf16 %v434_v22, %v430_v21  ;;  %v416_v31 = vld [vmem:[#allocation12 + $0x158] sm:$0xff]  ;;  %v838_v34 = vpack.c.bf16 %v433_v30, %v429_v26  ;;  %v113_v42 = vld [vmem:[#allocation7] sm:$0xff] }
  0x85   :  { %827 = vmatpush1.bf16.msra.mxu0 %v826_v63  ;;  %849 = vmatprep.subr.bf16.mxu1 %v848_v1  ;;  %v420_v32 = vld [vmem:[#allocation12 + $0x178] sm:$0xff]  ;;  %v858_v33 = vpack.c.bf16 %v411_v28, %v407_v27  ;;  %v415_v36 = vld [vmem:[#allocation12 + $0x150] sm:$0xff]  ;;  %v600_v53 = vld [vmem:[#allocation13] sm:$0xff] }
  0x86   :  { %829 = vmatprep.subr.bf16.mxu0 %v828_v5  ;;  %v860_v35 = vpack.c.bf16 %v420_v32, %v416_v31  ;;  %v419_v37 = vld [vmem:[#allocation12 + $0x170] sm:$0xff]  ;;  %v424_v39 = vld [vmem:[#allocation12 + $0x198] sm:$0xff]  ;;  %v601_v54 = vld [vmem:[#allocation13 + $0x8] sm:$0xff] }
  0x87   :  { %v428_v40 = vld [vmem:[#allocation12 + $0x1b8] sm:$0xff]  ;;  %v862_v41 = vpack.c.bf16 %v419_v37, %v415_v36  ;;  %v423_v44 = vld [vmem:[#allocation12 + $0x190] sm:$0xff]  ;;  %v873_v55 = vpack.c.bf16 %v601_v54, %v600_v53  ;;  %v604_v59 = vld [vmem:[#allocation13 + $0x20] sm:$0xff] }
  0x88   :  { %851 = vmatpush1.bf16.msra.mxu1 %v850_v11  ;;  %v864_v43 = vpack.c.bf16 %v428_v40, %v424_v39  ;;  %v427_v45 = vld [vmem:[#allocation12 + $0x1b0] sm:$0xff]  ;;  %v432_v46 = vld [vmem:[#allocation12 + $0x1d8] sm:$0xff]  ;;  %v605_v60 = vld [vmem:[#allocation13 + $0x28] sm:$0xff] }
  0x89   :  { %831 = vmatpush1.bf16.msra.mxu0 %v830_v12  ;;  %853 = vmatprep.subr.bf16.mxu1 %v852_v13  ;;  %v436_v47 = vld [vmem:[#allocation12 + $0x1f8] sm:$0xff]  ;;  %v866_v48 = vpack.c.bf16 %v427_v45, %v423_v44  ;;  %v431_v50 = vld [vmem:[#allocation12 + $0x1d0] sm:$0xff]  ;;  %v608_v1 = vld [vmem:[#allocation13 + $0x40] sm:$0xff] }
  0x8a   :  { %833 = vmatprep.subr.bf16.mxu0 %v832_v17  ;;  %v868_v49 = vpack.c.bf16 %v436_v47, %v432_v46  ;;  %v435_v51 = vld [vmem:[#allocation12 + $0x1f0] sm:$0xff]  ;;  %v603_v57 = vld [vmem:[#allocation13 + $0x18] sm:$0xff]  ;;  %v609_v2 = vld [vmem:[#allocation13 + $0x48] sm:$0xff]  ;;  %v132_v17 = vlaneseq }
  0x8b   :  { %v870_v52 = vpack.c.bf16 %v435_v51, %v431_v50  ;;  %v602_v56 = vld [vmem:[#allocation13 + $0x10] sm:$0xff]  ;;  %v607_v62 = vld [vmem:[#allocation13 + $0x38] sm:$0xff]  ;;  %v885_v3 = vpack.c.bf16 %v609_v2, %v608_v1  ;;  %v612_v7 = vld [vmem:[#allocation13 + $0x60] sm:$0xff] }
  0x8c   :  { %855 = vmatpush1.bf16.msra.mxu1 %v854_v23  ;;  %v876_v58 = vpack.c.bf16 %v603_v57, %v602_v56  ;;  %v606_v61 = vld [vmem:[#allocation13 + $0x30] sm:$0xff]  ;;  %v611_v5 = vld [vmem:[#allocation13 + $0x58] sm:$0xff]  ;;  %v613_v8 = vld [vmem:[#allocation13 + $0x68] sm:$0xff]  ;;  %v133_v18 = vshrl.u32 %v132_v17, 7 }
  0x8d   :  { %835 = vmatpush1.bf16.msra.mxu0 %v834_v24  ;;  %857 = vmatprep.subr.bf16.mxu1 %v856_v25  ;;  %v882_v63 = vpack.c.bf16 %v607_v62, %v606_v61  ;;  %v610_v4 = vld [vmem:[#allocation13 + $0x50] sm:$0xff]  ;;  %v891_v9 = vpack.c.bf16 %v613_v8, %v612_v7  ;;  %v615_v11 = vld [vmem:[#allocation13 + $0x78] sm:$0xff] }
  0x8e   :  { %837 = vmatprep.subr.bf16.mxu0 %v836_v29  ;;  %v888_v6 = vpack.c.bf16 %v611_v5, %v610_v4  ;;  %v614_v10 = vld [vmem:[#allocation13 + $0x70] sm:$0xff]  ;;  %v134_v19 = vsub.s32 0, %v133_v18  ;;  %v130_v20 = vld [vmem:[%s1331_s5] sm:$0x1f]  ;;  %v138_v21 = vsub.s32 1, %v133_v18  ;;  %v142_v31 = vsub.s32 2, %v133_v18 }
  0x8f   :  { %v894_v12 = vpack.c.bf16 %v615_v11, %v614_v10  ;;  %s1137_s5 = smov [#allocation16]  }
  0x90   :  { %859 = vmatpush1.bf16.msra.mxu1 %v858_v33  ;;  %v135_v22 = vrot.slane %v130_v20, %v134_v19  ;;  %v139_v23 = vrot.slane %v130_v20, %v138_v21  ;;  %v143_v32 = vrot.slane %v130_v20, %v142_v31  ;;  %s715_s18 = sshll.u32 %s1137_s5, 4  ;;  %s716_s18 = int_to_ptr.vmem [resolvable:$true] %s715_s18 }
  0x91   :  { %839 = vmatpush1.bf16.msra.mxu0 %v838_v34  ;;  %861 = vmatprep.subr.bf16.mxu1 %v860_v35  ;;  %s1066_s19 = scalar_lea.vmem %s716_s18, 128  ;;  %p1071_p7 = scmp.lt.s32.totalorder %s716_s18, %s716_s18 }
  0x92   :  { %872 = vmatprep.subr.bf16.mxu0 %v1135_v38  ;;  %p1067_p6 = scmp.ne.s32.totalorder %s716_s18, %s1066_s19  ;;  %p1072_p8 = scmp.lt.s32.totalorder %s1066_s19, %s1066_s19 }
  0x94   :  { %502 = vmatmul.mubr.f32.vlgmr.msra.gmra.mrb[0].mxu0 %v113_v42  ;;  %863 = vmatpush1.bf16.msra.mxu1 %v862_v41  ;;  %p1073_p9 = por %p1072_p8, %p1071_p7 }
  0x95   :  { %865 = vmatprep.subr.bf16.mxu1 %v864_v43  ;;  %794 = vmatprep.mubr.msk.f32.mxu0 %vm1136_vm1, %v1134_v0  ;;  %v879_v0 = vpack.c.bf16 %v605_v60, %v604_v59 }
  0x96   :  { %874 = vmatpush3.bf16.msra.mxu0 %v873_v55  ;;  %p1074_p10 = pnand %p1073_p9, %p1067_p6 }
  0x97   :  { %875 = vmatprep.subr.bf16.mxu0 %v1135_v38 }
  0x98   :  { %867 = vmatpush1.bf16.msra.mxu1 %v866_v48 }
  0x99   :  { %869 = vmatprep.subr.bf16.mxu1 %v868_v49 }
  0x9a   :  { %877 = vmatpush3.bf16.msra.mxu0 %v876_v58 }
  0x9b   :  { %878 = vmatprep.subr.bf16.mxu0 %v1135_v38 }
  0x9c   :  { %871 = vmatpush1.bf16.msra.mxu1 %v870_v52 }
  0x9e   :  { %880 = vmatpush3.bf16.msra.mxu0 %v879_v0 }
  0x9f   :  { %573 = vmatmul.mubr.f32.vlgmr.msra.gmra.mrb[2].mxu1 %v113_v42  ;;  %881 = vmatprep.subr.bf16.mxu0 %v1135_v38  ;;  %v115_v42 = vld [vmem:[#allocation9] sm:$0xff] }
  0xa2   :  { %883 = vmatpush3.bf16.msra.mxu0 %v882_v63 }
  0xa3   :  { %884 = vmatprep.subr.bf16.mxu0 %v1135_v38 }
  0xa6   :  { %886 = vmatpush3.bf16.msra.mxu0 %v885_v3 }
  0xa7   :  { %887 = vmatprep.subr.bf16.mxu0 %v1135_v38 }
  0xaa   :  { %889 = vmatpush3.bf16.msra.mxu0 %v888_v6 }
  0xab   :  { %890 = vmatprep.subr.bf16.mxu0 %v1135_v38 }
  0xae   :  { %892 = vmatpush3.bf16.msra.mxu0 %v891_v9 }
  0xaf   :  { %893 = vmatprep.subr.bf16.mxu0 %v1135_v38 }
  0xb2   :  { %895 = vmatpush3.bf16.msra.mxu0 %v894_v12 }
 0x149   :  { %v227_v13 = vpop.f32.mrb[0].mxu1 }
 0x14a   :  { %v229_v14 = vpop.f32.mrb[1].mxu1  ;;  %v228_v24 = vadd.f32 %v227_v13, %v135_v22 }
 0x14b   :  { %v230_v25 = vadd.f32 %v229_v14, %v139_v23 }
 0x152   :  { %v1293_v15 = vpop.f32.mrb[4].mxu1 }
 0x153   :  { %v761_v16 = vpop.f32.mrb[5].mxu1 }
 0x167   :  { %v503_v26 = vpop.f32.mrb[0].mxu0 }
 0x168   :  { %v579_v38 = vadd.f32 %v503_v26, %v228_v24  ;;  %v505_v27 = vpop.f32.mrb[1].mxu0 }
 0x169   :  { %v580_v28 = vadd.f32 %v505_v27, %v230_v25 }
 0x16a   :  { %v583_v29 = vmul.f32 0.5, %v579_v38 }
 0x16b   :  { %v587_v30 = vmul.f32 0.5, %v580_v28 }
 0x16c   :  { %924 = vtanh.f32 %v583_v29 }
 0x16d   :  { %926 = vtanh.f32 %v587_v30 }
 0x172   :  { %v574_v33 = vpop.f32.mrb[2].mxu1 }
 0x173   :  { %v900_v34 = vadd.f32 %v574_v33, %v143_v32  ;;  %v576_v35 = vpop.f32.mrb[3].mxu1 }
 0x175   :  { %928 = vtanh.f32 %v900_v34 }
 0x176   :  { %v925_v36 = vpop.eup %924 }
 0x177   :  { %v927_v37 = vpop.eup %926  ;;  %v585_v40 = vadd.f32 1.0, %v925_v36 }
 0x178   :  { %v589_v39 = vadd.f32 1.0, %v927_v37 }
 0x179   :  { %v586_v43 = vmul.f32 0.5, %v585_v40 }
 0x17a   :  { %v590_v41 = vmul.f32 0.5, %v589_v39 }
 0x17c   :  { %v596_v45 = vmul.f32 %v590_v41, %v115_v42 }
 0x17f   :  { %v929_v44 = vpop.eup %928 }
 0x180   :  { %v597_v46 = vmul.f32 %v929_v44, %v586_v43 }
 0x182   :  { %v598_v47 = vadd.f32 %v597_v46, %v596_v45 }
 0x184   :  { %930 = vtanh.f32 %v598_v47  ;;  %698 = vst [vmem:[#allocation16] sm:$0xff] %v598_v47 }
 0x18e   :  { %v931_v48 = vpop.eup %930 }
 0x18f   :  { %795 = vmatmul.mubr.f32.vlgmr.msra.gmra.mrb[2].mxu0 %v931_v48 }
 0x190   :  { %1077 = shalt.err (!%p1074_p10)
}
 0x191   :  { %s1078_s22 = scalar_lea.hbm %s1335_s9, 128 }
 0x192   :  { %p1079_p11 = scmp.ne.s32.totalorder %s1335_s9, %s1078_s22  ;;  %p1082_p12 = scmp.lt.u32.totalorder %s1078_s22, %s1335_s9 }
 0x194   :  { %p1084_p13 = pnand %p1082_p12, %p1079_p11 }
 0x196   :  { %1087 = shalt.err (!%p1084_p13)
}
 0x197   :  { %718 = dma.vmem_to_hbm [thread:$0]  %s716_s18, 128, %s1335_s9, [#allocation17]   ;;  %v146_v49 = vsub.s32 3, %v133_v18  ;;  %v150_v53 = vsub.s32 4, %v133_v18  ;;  %v734_v57 = vld [vmem:[%s1333_s7] ss:$0 sm:$0xff] }
 0x198   :  { %s1138_s27 = smov [#allocation15]  }
 0x199   :  { %v147_v50 = vrot.slane %v130_v20, %v146_v49  ;;  %v151_v54 = vrot.slane %v130_v20, %v150_v53  ;;  %s705_s28 = sshll.u32 %s1138_s27, 4  ;;  %s706_s28 = int_to_ptr.vmem [resolvable:$true] %s705_s28 }
 0x19a   :  { %s1088_s9 = scalar_lea.vmem %s706_s28, 128  ;;  %p1093_p1 = scmp.lt.s32.totalorder %s706_s28, %s706_s28 }
 0x19b   :  { %v901_v51 = vadd.f32 %v576_v35, %v147_v50  ;;  %v370_v56 = vadd.f32 %v1293_v15, %v151_v54  ;;  %p1089_p0 = scmp.ne.s32.totalorder %s706_s28, %s1088_s9  ;;  %p1094_p2 = scmp.lt.s32.totalorder %s1088_s9, %s1088_s9 }
 0x19d   :  { %v592_v52 = vmul.f32 0.5, %v901_v51  ;;  %v903_v59 = vadd.f32 %v734_v57, %v370_v56  ;;  %p1095_p3 = por %p1094_p2, %p1093_p1 }
 0x19f   :  { %932 = vtanh.f32 %v592_v52  ;;  %p1096_p4 = pnand %p1095_p3, %p1089_p0 }
 0x1a9   :  { %v933_v55 = vpop.eup %932 }
 0x1aa   :  { %v594_v58 = vadd.f32 1.0, %v933_v55 }
 0x1ac   :  { %v595_v0 = vmul.f32 0.5, %v594_v58 }
 0x262   :  { %v689_v60 = vpop.f32.mrb[2].mxu0 }
 0x263   :  { %v904_v61 = vadd.f32 %v903_v59, %v689_v60  ;;  %v796_v62 = vpop.f32.mrb[3].mxu0 }
 0x265   :  { %v694_v63 = vmul.f32 %v904_v61, %v595_v0 }
 0x267   :  { %697 = vst [vmem:[#allocation15] sm:$0xff] %v694_v63 }
 0x268   :  { %1099 = shalt.err (!%p1096_p4)
}
 0x269   :  { %s1100_s30 = scalar_lea.hbm %s1334_s8, 128 }
 0x26a   :  { %p1101_p5 = scmp.ne.s32.totalorder %s1334_s8, %s1100_s30  ;;  %p1104_p6 = scmp.lt.u32.totalorder %s1100_s30, %s1334_s8 }
 0x26c   :  { %p1106_p7 = pnand %p1104_p6, %p1101_p5 }
 0x26e   :  { %1109 = shalt.err (!%p1106_p7)
}
 0x26f   :  { %708 = dma.vmem_to_hbm [thread:$0]  %s706_s28, 128, %s1334_s8, [#allocation6]  }
 0x270   :  { %1118 = dma.done.wait [#allocation6], 128  }
 0x271   :  { %1119 = vsyncadd [#allocation6], 4294967168 }
 0x272   :  { %1120 = dma.done.wait [#allocation17], 128  }
 0x273   :  { %1121 = vsyncadd [#allocation17], 4294967168 }
 0x274   :  { %725 = vsyncpa [#allocation5], 1 }
 0x275   :  { %726 = vsyncpa [#allocation8], 1 }
 0x276   :  { %727 = vsyncpa [#allocation11], 1 }
 0x277   :  { %728 = vsyncpa [#allocation14], 1 }
 0x278   :  { %729 = vsyncpa [#allocation6], 1 }
 0x279   :  { %730 = vsyncpa [#allocation17], 1 }

</bundles_post_ra>
